<compile_context>
chip_gen: v6e
topology: v6e:2x2x1
jax: 0.10.0
libtpu: 0.0.40
codegen_flags: <defaults>
</compile_context>

<pallas_src>
import math

import numpy as np
import jax
import jax.numpy as jnp
from jax.experimental import pallas as pl
from jax.experimental.pallas import tpu as pltpu

# ---------------- config (small, consistent with FuseBlock's shapes) ----------
B = 2          # batch
S = 8          # query sequence length (image tokens)
T = 16         # feat_l sequence length (text tokens)
H = 32         # hidden_dim
NH = 4         # fuse_num_heads
HD = H // NH   # attention_head_size
MLP = 64       # fuse_mlp_dim
EPS = 1e-6

# ---- packed-slab geometry (both slabs are lane-dense: 128-wide, f32) ---------
WROWS = 96     # weight slab rows
CROWS = 112    # constant slab rows

# constant-slab row offsets
R_LN1W, R_LN1B, R_LN2W, R_LN2B = 0, 1, 2, 3
R_BQ, R_BK, R_BV, R_BO, R_B1, R_B2 = 4, 5, 6, 7, 8, 9
R_HSUM = 16     # (H, NH)   per-head lane-sum matrix, pre-scaled by 1/sqrt(HD)
R_HEXP = 48     # (NH, H)   per-head lane-broadcast matrix
R_SELT = 56     # (B*T, B)  broadcast a per-batch row to that batch's text rows
R_SELI = 88     # (B*S, B)  broadcast a per-batch row to that batch's image rows
R_SEGT = 104    # (B, B*T)  sum over a batch's text rows
R_SEGI = 106    # (B, B*S)  sum over a batch's image rows
R_TOK0 = 108    # (B, B*S)  select each batch's token-0 image row


def _layernorm(z, w, b):
    mu = jnp.mean(z, axis=-1, keepdims=True)
    var = jnp.mean((z - mu) ** 2, axis=-1, keepdims=True)   # biased, like torch LN
    return (z - mu) * jax.lax.rsqrt(var + EPS) * w + b


def _gelu_exact(z):
    # PyTorch F.gelu default (erf-based, approximate='none')
    return 0.5 * z * (1.0 + jax.lax.erf(z * (1.0 / math.sqrt(2.0))))


def fuse_block_kernel(act_ref, w_ref, c_ref, out_ref):
    f32 = jnp.float32

    def dot(a, b):
        return jnp.dot(a, b, preferred_element_type=f32)

    # ---- small params / helper matrices: static VMEM loads from the slabs ----
    ln1w = c_ref[R_LN1W:R_LN1W + 1, :H]
    ln1b = c_ref[R_LN1B:R_LN1B + 1, :H]
    ln2w = c_ref[R_LN2W:R_LN2W + 1, :H]
    ln2b = c_ref[R_LN2B:R_LN2B + 1, :H]
    bq = c_ref[R_BQ:R_BQ + 1, :H]
    bk = c_ref[R_BK:R_BK + 1, :H]
    bv = c_ref[R_BV:R_BV + 1, :H]
    bo = c_ref[R_BO:R_BO + 1, :H]
    b1 = c_ref[R_B1:R_B1 + 1, :MLP]
    b2 = c_ref[R_B2:R_B2 + 1, :H]
    head_sum_s = c_ref[R_HSUM:R_HSUM + H, :NH]        # (H, NH), 1/sqrt(HD) folded
    head_expand = c_ref[R_HEXP:R_HEXP + NH, :H]       # (NH, H)
    sel_text = c_ref[R_SELT:R_SELT + B * T, :B]       # (B*T, B)
    sel_img = c_ref[R_SELI:R_SELI + B * S, :B]        # (B*S, B)
    seg_text = c_ref[R_SEGT:R_SEGT + B, :B * T]       # (B, B*T)
    seg_img = c_ref[R_SEGI:R_SEGI + B, :B * S]        # (B, B*S)
    tok0 = c_ref[R_TOK0:R_TOK0 + B, :B * S]           # (B, B*S)

    wk = w_ref[0:H, 0:H]
    wv = w_ref[0:H, H:2 * H]
    wq = w_ref[0:H, 2 * H:3 * H]
    wo = w_ref[0:H, 3 * H:4 * H]
    w1 = w_ref[H:2 * H, 0:MLP]                        # (H, MLP)
    w2 = w_ref[H:H + MLP, MLP:MLP + H]                # (MLP, H)

    # ---- activations (pre-flattened / concatenated on the host) --------------
    x_img = act_ref[0:B * S, :]                       # (B*S, H) raw image rows
    fl = act_ref[B * S:B * S + B * T, :]              # (B*T, H) raw text rows

    # attention_norm on the image rows only; feat_l is NOT normalized.
    xn_img = _layernorm(x_img, ln1w, ln1b)            # (B*S, H)

    # token-0 rows via 0/1 select matmul (raw for residual, normed for query)
    x0 = dot(tok0, x_img)                             # (B, H)
    xn0 = dot(tok0, xn_img)                           # (B, H)

    # ---- projections ----------------------------------------------------------
    k_img = dot(xn_img, wk) + bk                      # (B*S, H)
    v_img = dot(xn_img, wv) + bv
    kt = dot(fl, wk) + bk                             # (B*T, H)
    vt = dot(fl, wv) + bv
    q0 = dot(xn0, wq) + bq                            # (B, H)

    # ---- stage 1: token-0 query attends over text keys/values (all batches) --
    qb = dot(sel_text, q0)                            # (B*T, H) broadcast per batch
    s1 = dot(qb * kt, head_sum_s)                     # (B*T, NH) scaled scores
    m1 = jnp.max(s1, axis=0, keepdims=True)           # per-head max (same const per group)
    e1 = jnp.exp(s1 - m1)
    num1 = dot(seg_text, dot(e1, head_expand) * vt)   # (B, H) unnormalized context
    den1 = dot(seg_text, e1)                          # (B, NH) softmax denominators
    v_t = num1 * dot(pl.reciprocal(den1, approx=True), head_expand)   # (B, H)

    # ---- stage 2: result attends over image keys/values ----------------------
    vb = dot(sel_img, v_t)                            # (B*S, H)
    s2 = dot(vb * k_img, head_sum_s)                  # (B*S, NH)
    m2 = jnp.max(s2, axis=0, keepdims=True)
    e2 = jnp.exp(s2 - m2)
    num2 = dot(seg_img, dot(e2, head_expand) * v_img)  # (B, H)
    den2 = dot(seg_img, e2)                            # (B, NH)
    ctx = num2 * dot(pl.reciprocal(den2, approx=True), head_expand)

    # ---- output projection, residuals, MLP (token-0 rows only) ---------------
    attn_out = dot(ctx, wo) + bo
    x1 = attn_out + x0                                # residual 1

    xn2 = _layernorm(x1, ln2w, ln2b)
    ff = dot(xn2, w1) + b1
    ff = _gelu_exact(ff)                              # dropout == identity (eval)
    ff = dot(ff, w2) + b2
    out_ref[...] = ff + x1                            # residual 2, = x2[:, 0]


def pack_params(ln1w, ln1b, wq, bq, wk, bk, wv, bv, wo, bo,
                ln2w, ln2b, w1, b1, w2, b2):
    """Host-side one-time packing into two lane-dense (rows, 128) slabs."""
    wslab = np.zeros((WROWS, 128), np.float32)
    wslab[0:H, 0:H] = np.asarray(wk)
    wslab[0:H, H:2 * H] = np.asarray(wv)
    wslab[0:H, 2 * H:3 * H] = np.asarray(wq)
    wslab[0:H, 3 * H:4 * H] = np.asarray(wo)
    wslab[H:2 * H, 0:MLP] = np.asarray(w1)
    wslab[H:H + MLP, MLP:MLP + H] = np.asarray(w2)

    c = np.zeros((CROWS, 128), np.float32)
    c[R_LN1W, :H] = np.asarray(ln1w)[0]
    c[R_LN1B, :H] = np.asarray(ln1b)[0]
    c[R_LN2W, :H] = np.asarray(ln2w)[0]
    c[R_LN2B, :H] = np.asarray(ln2b)[0]
    c[R_BQ, :H] = np.asarray(bq)[0]
    c[R_BK, :H] = np.asarray(bk)[0]
    c[R_BV, :H] = np.asarray(bv)[0]
    c[R_BO, :H] = np.asarray(bo)[0]
    c[R_B1, :MLP] = np.asarray(b1)[0]
    c[R_B2, :H] = np.asarray(b2)[0]

    scale = 1.0 / math.sqrt(HD)
    for n in range(NH):
        c[R_HSUM + n * HD:R_HSUM + (n + 1) * HD, n] = scale   # head_sum * scale
        c[R_HEXP + n, n * HD:(n + 1) * HD] = 1.0              # head_expand
    for b in range(B):
        c[R_SELT + b * T:R_SELT + (b + 1) * T, b] = 1.0
        c[R_SELI + b * S:R_SELI + (b + 1) * S, b] = 1.0
        c[R_SEGT + b, b * T:(b + 1) * T] = 1.0
        c[R_SEGI + b, b * S:(b + 1) * S] = 1.0
        c[R_TOK0 + b, b * S] = 1.0

    return jnp.asarray(wslab), jnp.asarray(c)


def fuse_block(x, feat_l, packed_params):
    wslab, cslab = packed_params
    # Host-side layout plumbing (free XLA work): one flattened activation slab.
    act = jnp.concatenate([x.reshape(B * S, H), feat_l.reshape(B * T, H)], axis=0)

    # NOTE: for many independent FuseBlock instances, stack them on a leading
    # grid axis marked "parallel" to amortize fixed overhead and use both
    # TensorCores on v7x; a single instance fits one invocation.
    return pl.pallas_call(
        fuse_block_kernel,
        out_shape=jax.ShapeDtypeStruct((B, H), jnp.float32),
        grid=(1,),
        in_specs=[
            pl.BlockSpec((B * S + B * T, H), lambda i: (0, 0)),   # activations
            pl.BlockSpec((WROWS, 128), lambda i: (0, 0)),         # weight slab
            pl.BlockSpec((CROWS, 128), lambda i: (0, 0)),         # constant slab
        ],
        out_specs=pl.BlockSpec((B, H), lambda i: (0, 0)),
        compiler_params=pltpu.CompilerParams(dimension_semantics=("arbitrary",)),
    )(act, wslab, cslab)


# ---------------------------- pure-JAX reference ------------------------------
def reference(x, fl, params):
    (ln1w, ln1b, wq, bq, wk, bk, wv, bv, wo, bo,
     ln2w, ln2b, w1, b1, w2, b2) = params

    def split_heads(z):                      # (B, L, H) -> (B, NH, L, HD)
        Bz, L, _ = z.shape
        return z.reshape(Bz, L, NH, HD).transpose(0, 2, 1, 3)

    h0 = x
    xn = _layernorm(x, ln1w[0], ln1b[0])
    q = split_heads(xn @ wq + bq[0])
    k = split_heads(xn @ wk + bk[0])
    v = split_heads(xn @ wv + bv[0])
    kt = split_heads(fl @ wk + bk[0])
    vt = split_heads(fl @ wv + bv[0])

    scale = 1.0 / math.sqrt(HD)
    p1 = jax.nn.softmax(jnp.einsum('bnsd,bntd->bnst', q, kt) * scale, axis=-1)
    v_t = jnp.einsum('bnst,bntd->bnsd', p1, vt)
    p2 = jax.nn.softmax(jnp.einsum('bnsd,bnqd->bnsq', v_t, k) * scale, axis=-1)
    ctx = jnp.einsum('bnsq,bnqd->bnsd', p2, v)
    ctx = ctx.transpose(0, 2, 1, 3).reshape(B, S, H)
    x1 = (ctx @ wo + bo[0]) + h0

    xn2 = _layernorm(x1, ln2w[0], ln2b[0])
    ff = _gelu_exact(xn2 @ w1 + b1[0]) @ w2 + b2[0]
    x2 = ff + x1
    return x2[:, 0]


# ---------------------------------- main --------------------------------------
if __name__ == "__main__":
    key = jax.random.PRNGKey(0)
    keys = jax.random.split(key, 24)

    x = jax.random.normal(keys[0], (B, S, H), jnp.float32)
    feat_l = jax.random.normal(keys[1], (B, T, H), jnp.float32)

    def lin(kw, kb, din, dout, scale=0.05):
        w = jax.random.normal(kw, (din, dout), jnp.float32) * scale
        b = jax.random.normal(kb, (1, dout), jnp.float32) * 0.01
        return w, b

    # non-trivial LayerNorm params to exercise the packed-parameter path
    ln1w = 1.0 + 0.1 * jax.random.normal(keys[14], (1, H), jnp.float32)
    ln1b = 0.02 * jax.random.normal(keys[15], (1, H), jnp.float32)
    ln2w = 1.0 + 0.1 * jax.random.normal(keys[16], (1, H), jnp.float32)
    ln2b = 0.02 * jax.random.normal(keys[17], (1, H), jnp.float32)
    wq, bq = lin(keys[2], keys[3], H, H)
    wk, bk = lin(keys[4], keys[5], H, H)
    wv, bv = lin(keys[6], keys[7], H, H)
    wo, bo = lin(keys[8], keys[9], H, H)
    w1, b1 = lin(keys[10], keys[11], H, MLP)
    w2, b2 = lin(keys[12], keys[13], MLP, H)

    raw_params = (ln1w, ln1b, wq, bq, wk, bk, wv, bv, wo, bo,
                  ln2w, ln2b, w1, b1, w2, b2)
    packed = pack_params(*raw_params)

    out = jax.block_until_ready(fuse_block(x, feat_l, packed))
    ref = jax.block_until_ready(reference(x, feat_l, raw_params))

    assert out.shape == (B, H)
    max_err = float(jnp.max(jnp.abs(out - ref)))
    if max_err > 5e-4:
        raise AssertionError(f"mismatch vs reference, max_err={max_err}")

    print("KERNEL_OK")
</pallas_src>

<mosaic_0001>
module attributes {stable_mosaic.version = 11 : i64} {
  func.func @fuse_block_kernel(%arg0: i32, %arg1: memref<48x32xf32, #tpu.memory_space<vmem>>, %arg2: memref<96x128xf32, #tpu.memory_space<vmem>>, %arg3: memref<112x128xf32, #tpu.memory_space<vmem>>, %arg4: memref<2x32xf32, #tpu.memory_space<vmem>>) attributes {dimension_semantics = [#tpu.dimension_semantics<arbitrary>], iteration_bounds = array<i64: 1>, scalar_prefetch = 0 : i64, scratch_operands = 0 : i64, tpu.core_type = #tpu.core_type<tc>, window_params = [{pipeline_mode = #tpu.pipeline_mode<synchronous>, transform_indices = @transform_0, window_bounds = array<i64: 48, 32>}, {pipeline_mode = #tpu.pipeline_mode<synchronous>, transform_indices = @transform_1, window_bounds = array<i64: 96, 128>}, {pipeline_mode = #tpu.pipeline_mode<synchronous>, transform_indices = @transform_2, window_bounds = array<i64: 112, 128>}, {pipeline_mode = #tpu.pipeline_mode<synchronous>, transform_indices = @transform_3, window_bounds = array<i64: 2, 32>}]} {
    %c0 = arith.constant 0 : index
    %c0_0 = arith.constant 0 : index
    %0 = vector.load %arg3[%c0, %c0_0] : memref<112x128xf32, #tpu.memory_space<vmem>>, vector<1x32xf32>
    %c1 = arith.constant 1 : index
    %c0_1 = arith.constant 0 : index
    %1 = vector.load %arg3[%c1, %c0_1] : memref<112x128xf32, #tpu.memory_space<vmem>>, vector<1x32xf32>
    %c2 = arith.constant 2 : index
    %c0_2 = arith.constant 0 : index
    %2 = vector.load %arg3[%c2, %c0_2] : memref<112x128xf32, #tpu.memory_space<vmem>>, vector<1x32xf32>
    %c3 = arith.constant 3 : index
    %c0_3 = arith.constant 0 : index
    %3 = vector.load %arg3[%c3, %c0_3] : memref<112x128xf32, #tpu.memory_space<vmem>>, vector<1x32xf32>
    %c4 = arith.constant 4 : index
    %c0_4 = arith.constant 0 : index
    %4 = vector.load %arg3[%c4, %c0_4] : memref<112x128xf32, #tpu.memory_space<vmem>>, vector<1x32xf32>
    %c5 = arith.constant 5 : index
    %c0_5 = arith.constant 0 : index
    %5 = vector.load %arg3[%c5, %c0_5] : memref<112x128xf32, #tpu.memory_space<vmem>>, vector<1x32xf32>
    %c6 = arith.constant 6 : index
    %c0_6 = arith.constant 0 : index
    %6 = vector.load %arg3[%c6, %c0_6] : memref<112x128xf32, #tpu.memory_space<vmem>>, vector<1x32xf32>
    %c7 = arith.constant 7 : index
    %c0_7 = arith.constant 0 : index
    %7 = vector.load %arg3[%c7, %c0_7] : memref<112x128xf32, #tpu.memory_space<vmem>>, vector<1x32xf32>
    %c8 = arith.constant 8 : index
    %c0_8 = arith.constant 0 : index
    %8 = vector.load %arg3[%c8, %c0_8] : memref<112x128xf32, #tpu.memory_space<vmem>>, vector<1x64xf32>
    %c9 = arith.constant 9 : index
    %c0_9 = arith.constant 0 : index
    %9 = vector.load %arg3[%c9, %c0_9] : memref<112x128xf32, #tpu.memory_space<vmem>>, vector<1x32xf32>
    %c16 = arith.constant 16 : index
    %c0_10 = arith.constant 0 : index
    %10 = vector.load %arg3[%c16, %c0_10] : memref<112x128xf32, #tpu.memory_space<vmem>>, vector<32x4xf32>
    %c48 = arith.constant 48 : index
    %c0_11 = arith.constant 0 : index
    %11 = vector.load %arg3[%c48, %c0_11] : memref<112x128xf32, #tpu.memory_space<vmem>>, vector<4x32xf32>
    %c56 = arith.constant 56 : index
    %c0_12 = arith.constant 0 : index
    %12 = vector.load %arg3[%c56, %c0_12] : memref<112x128xf32, #tpu.memory_space<vmem>>, vector<32x2xf32>
    %c88 = arith.constant 88 : index
    %c0_13 = arith.constant 0 : index
    %13 = vector.load %arg3[%c88, %c0_13] : memref<112x128xf32, #tpu.memory_space<vmem>>, vector<16x2xf32>
    %c104 = arith.constant 104 : index
    %c0_14 = arith.constant 0 : index
    %14 = vector.load %arg3[%c104, %c0_14] : memref<112x128xf32, #tpu.memory_space<vmem>>, vector<2x32xf32>
    %c106 = arith.constant 106 : index
    %c0_15 = arith.constant 0 : index
    %15 = vector.load %arg3[%c106, %c0_15] : memref<112x128xf32, #tpu.memory_space<vmem>>, vector<2x16xf32>
    %c108 = arith.constant 108 : index
    %c0_16 = arith.constant 0 : index
    %16 = vector.load %arg3[%c108, %c0_16] : memref<112x128xf32, #tpu.memory_space<vmem>>, vector<2x16xf32>
    %c0_17 = arith.constant 0 : index
    %c0_18 = arith.constant 0 : index
    %17 = vector.load %arg2[%c0_17, %c0_18] : memref<96x128xf32, #tpu.memory_space<vmem>>, vector<32x32xf32>
    %c0_19 = arith.constant 0 : index
    %c32 = arith.constant 32 : index
    %18 = vector.load %arg2[%c0_19, %c32] : memref<96x128xf32, #tpu.memory_space<vmem>>, vector<32x32xf32>
    %c0_20 = arith.constant 0 : index
    %c64 = arith.constant 64 : index
    %19 = vector.load %arg2[%c0_20, %c64] : memref<96x128xf32, #tpu.memory_space<vmem>>, vector<32x32xf32>
    %c0_21 = arith.constant 0 : index
    %c96 = arith.constant 96 : index
    %20 = vector.load %arg2[%c0_21, %c96] : memref<96x128xf32, #tpu.memory_space<vmem>>, vector<32x32xf32>
    %c32_22 = arith.constant 32 : index
    %c0_23 = arith.constant 0 : index
    %21 = vector.load %arg2[%c32_22, %c0_23] : memref<96x128xf32, #tpu.memory_space<vmem>>, vector<32x64xf32>
    %c32_24 = arith.constant 32 : index
    %c64_25 = arith.constant 64 : index
    %22 = vector.load %arg2[%c32_24, %c64_25] : memref<96x128xf32, #tpu.memory_space<vmem>>, vector<64x32xf32>
    %c0_26 = arith.constant 0 : index
    %c0_27 = arith.constant 0 : index
    %23 = vector.load %arg1[%c0_26, %c0_27] : memref<48x32xf32, #tpu.memory_space<vmem>>, vector<16x32xf32>
    %c16_28 = arith.constant 16 : index
    %c0_29 = arith.constant 0 : index
    %24 = vector.load %arg1[%c16_28, %c0_29] : memref<48x32xf32, #tpu.memory_space<vmem>>, vector<32x32xf32>
    %cst = arith.constant dense<0.000000e+00> : vector<16xf32>
    %25 = vector.multi_reduction <add>, %23, %cst [1] : vector<16x32xf32> to vector<16xf32>
    %26 = vector.shape_cast %25 : vector<16xf32> to vector<16x1xf32>
    %cst_30 = arith.constant 3.200000e+01 : f32
    %27 = vector.broadcast %cst_30 : f32 to vector<16x1xf32>
    %28 = arith.divf %26, %27 : vector<16x1xf32>
    %29 = vector.broadcast %28 : vector<16x1xf32> to vector<16x32xf32>
    %30 = arith.subf %23, %29 : vector<16x32xf32>
    %31 = arith.mulf %30, %30 : vector<16x32xf32>
    %cst_31 = arith.constant dense<0.000000e+00> : vector<16xf32>
    %32 = vector.multi_reduction <add>, %31, %cst_31 [1] : vector<16x32xf32> to vector<16xf32>
    %33 = vector.shape_cast %32 : vector<16xf32> to vector<16x1xf32>
    %cst_32 = arith.constant 3.200000e+01 : f32
    %34 = vector.broadcast %cst_32 : f32 to vector<16x1xf32>
    %35 = arith.divf %33, %34 : vector<16x1xf32>
    %36 = vector.broadcast %28 : vector<16x1xf32> to vector<16x32xf32>
    %37 = arith.subf %23, %36 : vector<16x32xf32>
    %cst_33 = arith.constant 9.99999997E-7 : f32
    %38 = vector.broadcast %cst_33 : f32 to vector<16x1xf32>
    %39 = arith.addf %35, %38 : vector<16x1xf32>
    %40 = math.rsqrt %39 : vector<16x1xf32>
    %41 = vector.broadcast %40 : vector<16x1xf32> to vector<16x32xf32>
    %42 = arith.mulf %37, %41 : vector<16x32xf32>
    %43 = vector.broadcast %0 : vector<1x32xf32> to vector<16x32xf32>
    %44 = arith.mulf %42, %43 : vector<16x32xf32>
    %45 = vector.broadcast %1 : vector<1x32xf32> to vector<16x32xf32>
    %46 = arith.addf %44, %45 : vector<16x32xf32>
    %cst_34 = arith.constant dense<0.000000e+00> : vector<2x32xf32>
    %47 = tpu.matmul %16, %23, %cst_34 {dimension_numbers = #tpu.dot_dimension_numbers<[1], [0], [0], [1], [0, 0, 1, 1], [], []>} : vector<2x16xf32>, vector<16x32xf32>, vector<2x32xf32> -> vector<2x32xf32>
    %cst_35 = arith.constant dense<0.000000e+00> : vector<2x32xf32>
    %48 = tpu.matmul %16, %46, %cst_35 {dimension_numbers = #tpu.dot_dimension_numbers<[1], [0], [0], [1], [0, 0, 1, 1], [], []>} : vector<2x16xf32>, vector<16x32xf32>, vector<2x32xf32> -> vector<2x32xf32>
    %cst_36 = arith.constant dense<0.000000e+00> : vector<16x32xf32>
    %49 = tpu.matmul %46, %17, %cst_36 {dimension_numbers = #tpu.dot_dimension_numbers<[1], [0], [0], [1], [0, 0, 1, 1], [], []>} : vector<16x32xf32>, vector<32x32xf32>, vector<16x32xf32> -> vector<16x32xf32>
    %50 = vector.broadcast %5 : vector<1x32xf32> to vector<16x32xf32>
    %51 = arith.addf %49, %50 : vector<16x32xf32>
    %cst_37 = arith.constant dense<0.000000e+00> : vector<16x32xf32>
    %52 = tpu.matmul %46, %18, %cst_37 {dimension_numbers = #tpu.dot_dimension_numbers<[1], [0], [0], [1], [0, 0, 1, 1], [], []>} : vector<16x32xf32>, vector<32x32xf32>, vector<16x32xf32> -> vector<16x32xf32>
    %53 = vector.broadcast %6 : vector<1x32xf32> to vector<16x32xf32>
    %54 = arith.addf %52, %53 : vector<16x32xf32>
    %cst_38 = arith.constant dense<0.000000e+00> : vector<32x32xf32>
    %55 = tpu.matmul %24, %17, %cst_38 {dimension_numbers = #tpu.dot_dimension_numbers<[1], [0], [0], [1], [0, 0, 1, 1], [], []>} : vector<32x32xf32>, vector<32x32xf32>, vector<32x32xf32> -> vector<32x32xf32>
    %56 = vector.broadcast %5 : vector<1x32xf32> to vector<32x32xf32>
    %57 = arith.addf %55, %56 : vector<32x32xf32>
    %cst_39 = arith.constant dense<0.000000e+00> : vector<32x32xf32>
    %58 = tpu.matmul %24, %18, %cst_39 {dimension_numbers = #tpu.dot_dimension_numbers<[1], [0], [0], [1], [0, 0, 1, 1], [], []>} : vector<32x32xf32>, vector<32x32xf32>, vector<32x32xf32> -> vector<32x32xf32>
    %59 = vector.broadcast %6 : vector<1x32xf32> to vector<32x32xf32>
    %60 = arith.addf %58, %59 : vector<32x32xf32>
    %cst_40 = arith.constant dense<0.000000e+00> : vector<2x32xf32>
    %61 = tpu.matmul %48, %19, %cst_40 {dimension_numbers = #tpu.dot_dimension_numbers<[1], [0], [0], [1], [0, 0, 1, 1], [], []>} : vector<2x32xf32>, vector<32x32xf32>, vector<2x32xf32> -> vector<2x32xf32>
    %62 = vector.broadcast %4 : vector<1x32xf32> to vector<2x32xf32>
    %63 = arith.addf %61, %62 : vector<2x32xf32>
    %cst_41 = arith.constant dense<0.000000e+00> : vector<32x32xf32>
    %64 = tpu.matmul %12, %63, %cst_41 {dimension_numbers = #tpu.dot_dimension_numbers<[1], [0], [0], [1], [0, 0, 1, 1], [], []>} : vector<32x2xf32>, vector<2x32xf32>, vector<32x32xf32> -> vector<32x32xf32>
    %65 = arith.mulf %64, %57 : vector<32x32xf32>
    %cst_42 = arith.constant dense<0.000000e+00> : vector<32x4xf32>
    %66 = tpu.matmul %65, %10, %cst_42 {dimension_numbers = #tpu.dot_dimension_numbers<[1], [0], [0], [1], [0, 0, 1, 1], [], []>} : vector<32x32xf32>, vector<32x4xf32>, vector<32x4xf32> -> vector<32x4xf32>
    %cst_43 = arith.constant dense<0xFF800000> : vector<4xf32>
    %67 = vector.multi_reduction <maximumf>, %66, %cst_43 [0] : vector<32x4xf32> to vector<4xf32>
    %68 = vector.shape_cast %67 : vector<4xf32> to vector<1x4xf32>
    %69 = vector.broadcast %68 : vector<1x4xf32> to vector<32x4xf32>
    %70 = arith.subf %66, %69 : vector<32x4xf32>
    %71 = math.exp %70 : vector<32x4xf32>
    %cst_44 = arith.constant dense<0.000000e+00> : vector<32x32xf32>
    %72 = tpu.matmul %71, %11, %cst_44 {dimension_numbers = #tpu.dot_dimension_numbers<[1], [0], [0], [1], [0, 0, 1, 1], [], []>} : vector<32x4xf32>, vector<4x32xf32>, vector<32x32xf32> -> vector<32x32xf32>
    %73 = arith.mulf %72, %60 : vector<32x32xf32>
    %cst_45 = arith.constant dense<0.000000e+00> : vector<2x32xf32>
    %74 = tpu.matmul %14, %73, %cst_45 {dimension_numbers = #tpu.dot_dimension_numbers<[1], [0], [0], [1], [0, 0, 1, 1], [], []>} : vector<2x32xf32>, vector<32x32xf32>, vector<2x32xf32> -> vector<2x32xf32>
    %cst_46 = arith.constant dense<0.000000e+00> : vector<2x4xf32>
    %75 = tpu.matmul %14, %71, %cst_46 {dimension_numbers = #tpu.dot_dimension_numbers<[1], [0], [0], [1], [0, 0, 1, 1], [], []>} : vector<2x32xf32>, vector<32x4xf32>, vector<2x4xf32> -> vector<2x4xf32>
    %76 = tpu.reciprocal %75 {approx = true} : vector<2x4xf32> -> vector<2x4xf32>
    %cst_47 = arith.constant dense<0.000000e+00> : vector<2x32xf32>
    %77 = tpu.matmul %76, %11, %cst_47 {dimension_numbers = #tpu.dot_dimension_numbers<[1], [0], [0], [1], [0, 0, 1, 1], [], []>} : vector<2x4xf32>, vector<4x32xf32>, vector<2x32xf32> -> vector<2x32xf32>
    %78 = arith.mulf %74, %77 : vector<2x32xf32>
    %cst_48 = arith.constant dense<0.000000e+00> : vector<16x32xf32>
    %79 = tpu.matmul %13, %78, %cst_48 {dimension_numbers = #tpu.dot_dimension_numbers<[1], [0], [0], [1], [0, 0, 1, 1], [], []>} : vector<16x2xf32>, vector<2x32xf32>, vector<16x32xf32> -> vector<16x32xf32>
    %80 = arith.mulf %79, %51 : vector<16x32xf32>
    %cst_49 = arith.constant dense<0.000000e+00> : vector<16x4xf32>
    %81 = tpu.matmul %80, %10, %cst_49 {dimension_numbers = #tpu.dot_dimension_numbers<[1], [0], [0], [1], [0, 0, 1, 1], [], []>} : vector<16x32xf32>, vector<32x4xf32>, vector<16x4xf32> -> vector<16x4xf32>
    %cst_50 = arith.constant dense<0xFF800000> : vector<4xf32>
    %82 = vector.multi_reduction <maximumf>, %81, %cst_50 [0] : vector<16x4xf32> to vector<4xf32>
    %83 = vector.shape_cast %82 : vector<4xf32> to vector<1x4xf32>
    %84 = vector.broadcast %83 : vector<1x4xf32> to vector<16x4xf32>
    %85 = arith.subf %81, %84 : vector<16x4xf32>
    %86 = math.exp %85 : vector<16x4xf32>
    %cst_51 = arith.constant dense<0.000000e+00> : vector<16x32xf32>
    %87 = tpu.matmul %86, %11, %cst_51 {dimension_numbers = #tpu.dot_dimension_numbers<[1], [0], [0], [1], [0, 0, 1, 1], [], []>} : vector<16x4xf32>, vector<4x32xf32>, vector<16x32xf32> -> vector<16x32xf32>
    %88 = arith.mulf %87, %54 : vector<16x32xf32>
    %cst_52 = arith.constant dense<0.000000e+00> : vector<2x32xf32>
    %89 = tpu.matmul %15, %88, %cst_52 {dimension_numbers = #tpu.dot_dimension_numbers<[1], [0], [0], [1], [0, 0, 1, 1], [], []>} : vector<2x16xf32>, vector<16x32xf32>, vector<2x32xf32> -> vector<2x32xf32>
    %cst_53 = arith.constant dense<0.000000e+00> : vector<2x4xf32>
    %90 = tpu.matmul %15, %86, %cst_53 {dimension_numbers = #tpu.dot_dimension_numbers<[1], [0], [0], [1], [0, 0, 1, 1], [], []>} : vector<2x16xf32>, vector<16x4xf32>, vector<2x4xf32> -> vector<2x4xf32>
    %91 = tpu.reciprocal %90 {approx = true} : vector<2x4xf32> -> vector<2x4xf32>
    %cst_54 = arith.constant dense<0.000000e+00> : vector<2x32xf32>
    %92 = tpu.matmul %91, %11, %cst_54 {dimension_numbers = #tpu.dot_dimension_numbers<[1], [0], [0], [1], [0, 0, 1, 1], [], []>} : vector<2x4xf32>, vector<4x32xf32>, vector<2x32xf32> -> vector<2x32xf32>
    %93 = arith.mulf %89, %92 : vector<2x32xf32>
    %cst_55 = arith.constant dense<0.000000e+00> : vector<2x32xf32>
    %94 = tpu.matmul %93, %20, %cst_55 {dimension_numbers = #tpu.dot_dimension_numbers<[1], [0], [0], [1], [0, 0, 1, 1], [], []>} : vector<2x32xf32>, vector<32x32xf32>, vector<2x32xf32> -> vector<2x32xf32>
    %95 = vector.broadcast %7 : vector<1x32xf32> to vector<2x32xf32>
    %96 = arith.addf %94, %95 : vector<2x32xf32>
    %97 = arith.addf %96, %47 : vector<2x32xf32>
    %cst_56 = arith.constant dense<0.000000e+00> : vector<2xf32>
    %98 = vector.multi_reduction <add>, %97, %cst_56 [1] : vector<2x32xf32> to vector<2xf32>
    %99 = vector.shape_cast %98 : vector<2xf32> to vector<2x1xf32>
    %cst_57 = arith.constant 3.200000e+01 : f32
    %100 = vector.broadcast %cst_57 : f32 to vector<2x1xf32>
    %101 = arith.divf %99, %100 : vector<2x1xf32>
    %102 = vector.broadcast %101 : vector<2x1xf32> to vector<2x32xf32>
    %103 = arith.subf %97, %102 : vector<2x32xf32>
    %104 = arith.mulf %103, %103 : vector<2x32xf32>
    %cst_58 = arith.constant dense<0.000000e+00> : vector<2xf32>
    %105 = vector.multi_reduction <add>, %104, %cst_58 [1] : vector<2x32xf32> to vector<2xf32>
    %106 = vector.shape_cast %105 : vector<2xf32> to vector<2x1xf32>
    %cst_59 = arith.constant 3.200000e+01 : f32
    %107 = vector.broadcast %cst_59 : f32 to vector<2x1xf32>
    %108 = arith.divf %106, %107 : vector<2x1xf32>
    %109 = vector.broadcast %101 : vector<2x1xf32> to vector<2x32xf32>
    %110 = arith.subf %97, %109 : vector<2x32xf32>
    %cst_60 = arith.constant 9.99999997E-7 : f32
    %111 = vector.broadcast %cst_60 : f32 to vector<2x1xf32>
    %112 = arith.addf %108, %111 : vector<2x1xf32>
    %113 = math.rsqrt %112 : vector<2x1xf32>
    %114 = vector.broadcast %113 : vector<2x1xf32> to vector<2x32xf32>
    %115 = arith.mulf %110, %114 : vector<2x32xf32>
    %116 = vector.broadcast %2 : vector<1x32xf32> to vector<2x32xf32>
    %117 = arith.mulf %115, %116 : vector<2x32xf32>
    %118 = vector.broadcast %3 : vector<1x32xf32> to vector<2x32xf32>
    %119 = arith.addf %117, %118 : vector<2x32xf32>
    %cst_61 = arith.constant dense<0.000000e+00> : vector<2x64xf32>
    %120 = tpu.matmul %119, %21, %cst_61 {dimension_numbers = #tpu.dot_dimension_numbers<[1], [0], [0], [1], [0, 0, 1, 1], [], []>} : vector<2x32xf32>, vector<32x64xf32>, vector<2x64xf32> -> vector<2x64xf32>
    %121 = vector.broadcast %8 : vector<1x64xf32> to vector<2x64xf32>
    %122 = arith.addf %120, %121 : vector<2x64xf32>
    %cst_62 = arith.constant 5.000000e-01 : f32
    %123 = vector.broadcast %cst_62 : f32 to vector<2x64xf32>
    %124 = arith.mulf %123, %122 : vector<2x64xf32>
    %cst_63 = arith.constant 0.707106769 : f32
    %125 = vector.broadcast %cst_63 : f32 to vector<2x64xf32>
    %126 = arith.mulf %122, %125 : vector<2x64xf32>
    %127 = math.erf %126 : vector<2x64xf32>
    %cst_64 = arith.constant 1.000000e+00 : f32
    %128 = vector.broadcast %cst_64 : f32 to vector<2x64xf32>
    %129 = arith.addf %128, %127 : vector<2x64xf32>
    %130 = arith.mulf %124, %129 : vector<2x64xf32>
    %cst_65 = arith.constant dense<0.000000e+00> : vector<2x32xf32>
    %131 = tpu.matmul %130, %22, %cst_65 {dimension_numbers = #tpu.dot_dimension_numbers<[1], [0], [0], [1], [0, 0, 1, 1], [], []>} : vector<2x64xf32>, vector<64x32xf32>, vector<2x32xf32> -> vector<2x32xf32>
    %132 = vector.broadcast %9 : vector<1x32xf32> to vector<2x32xf32>
    %133 = arith.addf %131, %132 : vector<2x32xf32>
    %134 = arith.addf %133, %97 : vector<2x32xf32>
    %c0_66 = arith.constant 0 : index
    %c0_67 = arith.constant 0 : index
    %135 = vector.load %arg4[%c0_66, %c0_67] : memref<2x32xf32, #tpu.memory_space<vmem>>, vector<2x32xf32>
    tpu.vector_store %arg4[%c0_66, %c0_67], %134 {strides = array<i32>} : memref<2x32xf32, #tpu.memory_space<vmem>>, vector<2x32xf32>,
    return
  }
  func.func @transform_0(%arg0: i32) -> (i32, i32) {
    %c0_i32 = arith.constant 0 : i32
    %c0_i32_0 = arith.constant 0 : i32
    %c0_i32_1 = arith.constant 0 : i32
    return %c0_i32, %c0_i32_0 : i32, i32
  }
  func.func @transform_1(%arg0: i32) -> (i32, i32) {
    %c0_i32 = arith.constant 0 : i32
    %c0_i32_0 = arith.constant 0 : i32
    %c0_i32_1 = arith.constant 0 : i32
    return %c0_i32, %c0_i32_0 : i32, i32
  }
  func.func @transform_2(%arg0: i32) -> (i32, i32) {
    %c0_i32 = arith.constant 0 : i32
    %c0_i32_0 = arith.constant 0 : i32
    %c0_i32_1 = arith.constant 0 : i32
    return %c0_i32, %c0_i32_0 : i32, i32
  }
  func.func @transform_3(%arg0: i32) -> (i32, i32) {
    %c0_i32 = arith.constant 0 : i32
    %c0_i32_0 = arith.constant 0 : i32
    %c0_i32_1 = arith.constant 0 : i32
    return %c0_i32, %c0_i32_0 : i32, i32
  }
}

</mosaic_0001>

<bundles_post_ra>
// kernel: tpu_custom_call.1
= control target key start
LH: loop header
LB: loop body
LE: loop exit
PB: predicated region body
PF: predicated region fallthrough
CT: control target
= control target key end

     0   :  { %8 = vsyncpa [#allocation3], 0  ;;  %s2899_s0 = inlined_call_operand.vmem [shape: f32[48,32], index: 0, kind: input, shape index: {}]   ;;  %s2900_s1 = inlined_call_operand.hbm [shape: f32[96,128], index: 1, kind: input, shape index: {}]   ;;  %s2901_s2 = inlined_call_operand.hbm [shape: f32[112,128], index: 2, kind: input, shape index: {}]   ;;  %s2902_s3 = inlined_call_operand.hbm [shape: f32[2,32], index: 3, kind: output, shape index: {}]  }
   0x1   :  { %9 = vsyncpa [#allocation6], 0 }
   0x2   :  { %10 = vsyncpa [#allocation4], 0  ;;  %s2562_s12 = smov [#allocation2]  }
   0x3   :  { %s18_s13 = sshll.u32 %s2562_s12, 4  ;;  %s19_s13 = int_to_ptr.vmem [resolvable:$true] %s18_s13 }
   0x4   :  { %s2504_s14 = scalar_lea.vmem %s19_s13, 1536  ;;  %p2509_p1 = scmp.lt.s32.totalorder %s19_s13, %s19_s13 }
   0x5   :  { %p2505_p0 = scmp.ne.s32.totalorder %s19_s13, %s2504_s14  ;;  %p2510_p2 = scmp.lt.s32.totalorder %s2504_s14, %s2504_s14 }
   0x7   :  { %p2511_p3 = por %p2510_p2, %p2509_p1 }
   0x9   :  { %p2512_p4 = pnand %p2511_p3, %p2505_p0 }
   0xb   :  { %2515 = shalt.err (!%p2512_p4)
}
   0xc   :  { %s2563_s15 = smov 128   ;;  %s2564_s16 = smov 8  }
   0xd   :  { %24 = dma.hbm_to_vmem [thread:$0]  %s2900_s1, 1536, %s19_s13, [#allocation3], %s2563_s15, %s2563_s15, %s2564_s16  }
   0xe   :  { %s2565_s19 = smov [#allocation5]  }
   0xf   :  { %s30_s20 = sshll.u32 %s2565_s19, 4  ;;  %s31_s20 = int_to_ptr.vmem [resolvable:$true] %s30_s20 }
  0x10   :  { %s2524_s21 = scalar_lea.vmem %s31_s20, 1792  ;;  %p2529_p6 = scmp.lt.s32.totalorder %s31_s20, %s31_s20 }
  0x11   :  { %p2525_p5 = scmp.ne.s32.totalorder %s31_s20, %s2524_s21  ;;  %p2530_p7 = scmp.lt.s32.totalorder %s2524_s21, %s2524_s21 }
  0x13   :  { %p2531_p8 = por %p2530_p7, %p2529_p6 }
  0x15   :  { %p2532_p9 = pnand %p2531_p8, %p2525_p5 }
  0x17   :  { %2535 = shalt.err (!%p2532_p9)
}
  0x18   :  { %36 = dma.hbm_to_vmem [thread:$0]  %s2901_s2, 1792, %s31_s20, [#allocation6], %s2563_s15, %s2563_s15, %s2564_s16  }
  0x19   :  { %2556 = dma.done.wait [#allocation3], 1536  }
  0x1a   :  { %2557 = vsyncadd [#allocation3], 4294965760 }
  0x1b   :  { %2558 = dma.done.wait [#allocation6], 1792  }
  0x1c   :  { %2559 = vsyncadd [#allocation6], 4294965504  ;;  %vm89_vm0 = vcmask 261120   ;;  %v84_v0 = vld [vmem:[%s2899_s0 + $0x8] sm:$0xff]  ;;  %v83_v1 = vld [vmem:[%s2899_s0] sm:$0xff]  ;;  %s2566_s2 = smov 64  }
  0x1d   :  { %v93_v2 = vsel %vm89_vm0, %v84_v0, 0.0  ;;  %v90_v3 = vsel %vm89_vm0, %v83_v1, 0.0  ;;  %v2606_v4 = vld [vmem:[#allocation2 + $0x18] sm:$0xff]  ;;  %s2567_s27 = smov 96   ;;  %v2611_v5 = vld [vmem:[#allocation2 + $0x8] sm:$0xff]  ;;  %v2624_v16 = vld [vmem:[#allocation2 + $0x10] sm:$0xff] }
  0x1e   :  { %94 = vadd.xlane.f32.xlu0 %v93_v2  ;;  %v2568_v17 = vmov 0.0   ;;  %v2634_v18 = vld [vmem:[#allocation2] sm:$0xff]  ;;  %vm2569_vm1 = vmmov 0   ;;  %v66_v19 = vld [vmem:[#allocation5 + $0x6c] sm:$0x3]  ;;  %vm129_vm2 = vcmask 130048  }
  0x1f   :  { %2256 = vmatprep.subr.mxu1 %v2568_v17  ;;  %2249 = vmatprep.subr.mxu0 %v2568_v17  ;;  %v2656_v20 = vld [vmem:[%s2899_s0 + $0x10] sm:$0xff]  ;;  %v2661_v21 = vld [vmem:[%s2899_s0 + $0x18] sm:$0xff]  ;;  %v2666_v22 = vld [vmem:[%s2899_s0 + $0x20] sm:$0xff]  ;;  %vm724_vm3 = vcmask 15360   ;;  %vm737_vm4 = vcmask 1041408   ;;  %vm965_vm5 = vcmask 1043456  }
  0x20   :  { %2250 = vmatpush3.msra.mxu0 %v84_v0  ;;  %2260 = vmatprep.mubr.msk.f32.mxu1 %vm2569_vm1, %v2568_v17  ;;  %v2677_v24 = vld [vmem:[%s2899_s0 + $0x28] sm:$0xff]  ;;  %v2083_v35 = vld [vmem:[#allocation5] ss:$0 sm:$0xff]  ;;  %v2084_v37 = vld [vmem:[#allocation5 + $0x1] ss:$0 sm:$0xff]  ;;  %vm927_vm6 = vcmask 31744  }
  0x21   :  { %2251 = vmatprep.subr.mxu0 %v2568_v17  ;;  %2253 = vmatprep.mubr.msk.f32.mxu0 %vm2569_vm1, %v2568_v17  ;;  %v2717_v54 = vld [vmem:[#allocation5 + $0x6] ss:$0 sm:$0xff]  ;;  %v58_v59 = vld [vmem:[#allocation5 + $0x38] sm:$0xff]  ;;  %v2726_v60 = vld [vmem:[#allocation5 + $0x28] sm:$0xff]  ;;  %s2570_s0 = smov 32   ;;  %vm1849_vm7 = vcmask 254976  }
  0x22   :  { %91 = vadd.xlane.f32.xlu0 %v90_v3  ;;  %2252 = vmatpush3.msra.mxu0 %v83_v1  ;;  %vm1991_vm8 = vcmask 523264   ;;  %s2571_s9 = smov [#allocation7]  }
  0x23   :  { %2285 = vmatprep.subr.mxu0 %v2606_v4  ;;  %2254 = vmatmul.mubr.msk.f32.vlgmr.msra.gmra.mxu0 %vm129_vm2, %v66_v19  ;;  %s2073_s10 = sshll.u32 %s2571_s9, 4  ;;  %s2074_s10 = int_to_ptr.vmem [resolvable:$true] %s2073_s10 }
  0x24   :  { %2286 = vmatpush3.msra.mxu0 %v2606_v4  ;;  %2293 = vmatprep.mubr.msk.f32.mxu0 %vm89_vm0, %v2656_v20  ;;  %s2536_s11 = scalar_lea.vmem %s2074_s10, 32  ;;  %p2541_p11 = scmp.lt.s32.totalorder %s2074_s10, %s2074_s10 }
  0x25   :  { %2287 = vmatprep.subr.mxu0 %v2624_v16  ;;  %p2537_p10 = scmp.ne.s32.totalorder %s2074_s10, %s2536_s11  ;;  %p2542_p12 = scmp.lt.s32.totalorder %s2536_s11, %s2536_s11 }
  0x26   :  { %2288 = vmatpush3.msra.mxu0 %v2624_v16 }
  0x27   :  { %2289 = vmatprep.subr.mxu0 %v2611_v5  ;;  %p2543_p13 = por %p2542_p12, %p2541_p11 }
  0x28   :  { %2290 = vmatpush3.msra.mxu0 %v2611_v5 }
  0x29   :  { %2291 = vmatprep.subr.mxu0 %v2634_v18  ;;  %p2544_p0 = pnand %p2543_p13, %p2537_p10 }
  0x2a   :  { %2292 = vmatpush3.msra.mxu0 %v2634_v18 }
  0x2b   :  { %2313 = vmatprep.subr.mxu0 %v2568_v17  ;;  %2294 = vmatmul.mubr.msk.f32.vlgmr.msra.gmra.mxu0 %vm89_vm0, %v2661_v21 }
  0x2c   :  { %2296 = vmatprep.mubr.msk.f32.mxu0 %vm89_vm0, %v2666_v22 }
  0x2f   :  { %2297 = vmatmul.mubr.msk.f32.gmra.mxu0 %vm89_vm0, %v2677_v24 }
  0x30   :  { %2321 = vmatprep.mubr.msk.f32.mxu0 %vm2569_vm1, %v2568_v17 }
  0x38   :  { %645 = vrot.lane.b32.xlu0 %v2606_v4, %s2566_s2 }
  0x3c   :  { %372 = vrot.lane.b32.xlu0 %v2606_v4, %s2567_s27 }
  0x40   :  { %368 = vrot.lane.b32.xlu0 %v2611_v5, %s2567_s27 }
  0x44   :  { %1769 = vrot.lane.b32.xlu0 %v2606_v4, %s2570_s0 }
  0x48   :  { %1765 = vrot.lane.b32.xlu0 %v2611_v5, %s2570_s0 }
  0xa7   :  { %v95_v6 = vpop.xlane.xlu0 %94 }
  0xa8   :  { %v98_v7 = vmul.f32 0.03125, %v95_v6 }
  0xaa   :  { %v2614_v8 = vsub.f32 %v84_v0, %v98_v7  ;;  %v59_v7 = vld [vmem:[#allocation5 + $0x40] sm:$0xff] }
  0xab   :  { %v92_v9 = vpop.xlane.xlu0 %91 }
  0xac   :  { %v97_v10 = vmul.f32 0.03125, %v92_v9  ;;  %v102_v11 = vmul.f32 %v2614_v8, %v2614_v8  ;;  %v61_v9 = vld [vmem:[#allocation5 + $0x50] sm:$0xff] }
  0xae   :  { %v2618_v12 = vsub.f32 %v83_v1, %v97_v10  ;;  %v106_v13 = vsel %vm89_vm0, %v102_v11, 0.0  ;;  %v2101_v1 = vld [vmem:[#allocation5 + $0x4] ss:$0 sm:$0xff]  ;;  %v2739_v11 = vld [vmem:[#allocation5 + $0x18] sm:$0xff] }
  0xaf   :  { %107 = vadd.xlane.f32.xlu1 %v106_v13  ;;  %v646_v23 = vpop.permute.xlu0 %645  ;;  %v2735_v10 = vld [vmem:[#allocation5 + $0x20] sm:$0xff] }
  0xb0   :  { %v101_v14 = vmul.f32 %v2618_v12, %v2618_v12  ;;  %2314 = vmatpush3.msra.mxu0 %v646_v23 }
  0xb1   :  { %2315 = vmatprep.subr.mxu0 %v2568_v17 }
  0xb2   :  { %v103_v15 = vsel %vm89_vm0, %v101_v14, 0.0 }
  0xb3   :  { %104 = vadd.xlane.f32.xlu1 %v103_v15  ;;  %v373_v44 = vpop.permute.xlu0 %372 }
  0xb7   :  { %v369_v46 = vpop.permute.xlu0 %368 }
  0xc4   :  { %643 = vrot.lane.b32.xlu1 %v2624_v16, %s2566_s2 }
  0xc8   :  { %641 = vrot.lane.b32.xlu1 %v2611_v5, %s2566_s2 }
  0xcc   :  { %639 = vrot.lane.b32.xlu1 %v2634_v18, %s2566_s2 }
  0xd0   :  { %370 = vrot.lane.b32.xlu1 %v2624_v16, %s2567_s27 }
  0xd4   :  { %366 = vrot.lane.b32.xlu1 %v2634_v18, %s2567_s27 }
  0xd8   :  { %1767 = vrot.lane.b32.xlu1 %v2624_v16, %s2570_s0 }
  0xdc   :  { %1763 = vrot.lane.b32.xlu1 %v2634_v18, %s2570_s0 }
  0xe3   :  { %v2710_v48 = vpop.f32.mrf.mxu0 }
  0xe5   :  { %v2255_v49 = vpop.f32.mrf.mxu0 }
  0xeb   :  { %v2295_v61 = vpop.f32.mrf.mxu0 }
  0xed   :  { %v531_v62 = vpop.f32.mrf.mxu0 }
  0xef   :  { %v2298_v63 = vpop.f32.mrf.mxu0 }
  0xf1   :  { %v541_v0 = vpop.f32.mrf.mxu0 }
 0x138   :  { %v108_v25 = vpop.xlane.xlu1 %107 }
 0x139   :  { %v110_v26 = vmul.f32 0.03125, %v108_v25 }
 0x13b   :  { %v112_v27 = vadd.f32 1e-06, %v110_v26 }
 0x13c   :  { %v105_v28 = vpop.xlane.xlu1 %104 }
 0x13d   :  { %2472 = vrsqrt.f32 %v112_v27  ;;  %v109_v29 = vmul.f32 0.03125, %v105_v28 }
 0x13f   :  { %v111_v30 = vadd.f32 1e-06, %v109_v29 }
 0x140   :  { %v644_v31 = vpop.permute.xlu1 %643 }
 0x141   :  { %2474 = vrsqrt.f32 %v111_v30  ;;  %2316 = vmatpush3.msra.mxu0 %v644_v31 }
 0x142   :  { %2317 = vmatprep.subr.mxu0 %v2568_v17 }
 0x144   :  { %v642_v32 = vpop.permute.xlu1 %641 }
 0x145   :  { %2318 = vmatpush3.msra.mxu0 %v642_v32 }
 0x146   :  { %2319 = vmatprep.subr.mxu0 %v2568_v17 }
 0x148   :  { %v640_v33 = vpop.permute.xlu1 %639 }
 0x149   :  { %2320 = vmatpush3.msra.mxu0 %v640_v33  ;;  %v2768_v33 = vld [vmem:[#allocation5 + $0x30] sm:$0xf] }
 0x14a   :  { %v2473_v34 = vpop.eup %2472  ;;  %2332 = vmatprep.subr.mxu0 %v2726_v60 }
 0x14b   :  { %v116_v36 = vmul.f32 %v2473_v34, %v2614_v8  ;;  %v60_v8 = vld [vmem:[#allocation5 + $0x48] sm:$0xff] }
 0x14c   :  { %v371_v45 = vpop.permute.xlu1 %370 }
 0x14d   :  { %v122_v38 = vmul.f32 %v2083_v35, %v116_v36 }
 0x14e   :  { %v2475_v39 = vpop.eup %2474 }
 0x14f   :  { %v128_v40 = vadd.f32 %v2084_v37, %v122_v38  ;;  %v115_v41 = vmul.f32 %v2475_v39, %v2618_v12  ;;  %v2743_v12 = vld [vmem:[#allocation5 + $0x10] sm:$0xff] }
 0x150   :  { %v367_v47 = vpop.permute.xlu1 %366 }
 0x151   :  { %2257 = vmatpush3.msra.mxu1 %v128_v40  ;;  %v121_v42 = vmul.f32 %v2083_v35, %v115_v41 }
 0x152   :  { %2258 = vmatprep.subr.mxu1 %v2568_v17 }
 0x153   :  { %v127_v43 = vadd.f32 %v2084_v37, %v121_v42 }
 0x155   :  { %2259 = vmatpush3.msra.mxu1 %v127_v43 }
 0x156   :  { %2261 = vmatmul.mubr.msk.f32.vlgmr.msra.gmra.mxu1 %vm129_vm2, %v66_v19  ;;  %2263 = vmatprep.subr.mxu1 %v2606_v4 }
 0x157   :  { %2264 = vmatpush3.msra.mxu1 %v2606_v4  ;;  %2271 = vmatprep.mubr.msk.f32.mxu1 %vm89_vm0, %v127_v43  ;;  %v1770_v4 = vpop.permute.xlu0 %1769 }
 0x158   :  { %2265 = vmatprep.subr.mxu1 %v2624_v16 }
 0x159   :  { %2266 = vmatpush3.msra.mxu1 %v2624_v16  ;;  %v1768_v16 = vpop.permute.xlu1 %1767 }
 0x15a   :  { %2267 = vmatprep.subr.mxu1 %v2611_v5 }
 0x15b   :  { %2268 = vmatpush3.msra.mxu1 %v2611_v5 }
 0x15c   :  { %2269 = vmatprep.subr.mxu1 %v2634_v18 }
 0x15d   :  { %2270 = vmatpush3.msra.mxu1 %v2634_v18  ;;  %v1766_v18 = vpop.permute.xlu0 %1765 }
 0x15e   :  { %2272 = vmatmul.mubr.msk.f32.vlgmr.msra.gmra.mxu1 %vm89_vm0, %v128_v40  ;;  %2274 = vmatprep.subr.mxu1 %v373_v44 }
 0x15f   :  { %2275 = vmatpush3.msra.mxu1 %v373_v44  ;;  %2282 = vmatprep.mubr.msk.f32.mxu1 %vm89_vm0, %v127_v43 }
 0x160   :  { %2276 = vmatprep.subr.mxu1 %v371_v45 }
 0x161   :  { %2277 = vmatpush3.msra.mxu1 %v371_v45 }
 0x162   :  { %2278 = vmatprep.subr.mxu1 %v369_v46 }
 0x163   :  { %2279 = vmatpush3.msra.mxu1 %v369_v46 }
 0x164   :  { %2280 = vmatprep.subr.mxu1 %v367_v47 }
 0x165   :  { %2281 = vmatpush3.msra.mxu1 %v367_v47 }
 0x166   :  { %2283 = vmatmul.mubr.msk.f32.vlgmr.msra.gmra.mxu1 %vm89_vm0, %v128_v40  ;;  %2299 = vmatprep.subr.mxu1 %v373_v44 }
 0x167   :  { %2300 = vmatpush3.msra.mxu1 %v373_v44  ;;  %2307 = vmatprep.mubr.msk.f32.mxu1 %vm89_vm0, %v2656_v20  ;;  %v2756_v20 = vld [vmem:[#allocation5 + $0x5] ss:$0 sm:$0xff] }
 0x168   :  { %2301 = vmatprep.subr.mxu1 %v371_v45  ;;  %v537_v23 = vadd.f32 %v2295_v61, %v2756_v20  ;;  %v542_v28 = vadd.f32 %v2756_v20, %v541_v0  ;;  %v547_v29 = vadd.f32 %v2298_v63, %v2756_v20 }
 0x169   :  { %2302 = vmatpush3.msra.mxu1 %v371_v45 }
 0x16a   :  { %2303 = vmatprep.subr.mxu1 %v369_v46 }
 0x16b   :  { %2304 = vmatpush3.msra.mxu1 %v369_v46 }
 0x16c   :  { %2305 = vmatprep.subr.mxu1 %v367_v47 }
 0x16d   :  { %2306 = vmatpush3.msra.mxu1 %v367_v47 }
 0x16e   :  { %2308 = vmatmul.mubr.msk.f32.vlgmr.msra.gmra.mxu1 %vm89_vm0, %v2661_v21 }
 0x16f   :  { %2310 = vmatprep.mubr.msk.f32.mxu1 %vm89_vm0, %v2666_v22  ;;  %v532_v22 = vadd.f32 %v2756_v20, %v531_v62 }
 0x172   :  { %2311 = vmatmul.mubr.msk.f32.gmra.mxu1 %vm89_vm0, %v2677_v24 }
 0x173   :  { %2326 = vmatprep.mubr.msk.f32.mxu1 %vm724_vm3, %v58_v59 }
 0x216   :  { %v269_v50 = vpop.f32.mrf.mxu1 }
 0x217   :  { %2322 = vmatmul.mubr.msk.f32.vlgmr.msra.gmra.mxu0 %vm89_vm0, %v269_v50 }
 0x218   :  { %v2262_v51 = vpop.f32.mrf.mxu1  ;;  %2333 = vmatpush3.msra.mxu0 %v2726_v60 }
 0x219   :  { %2334 = vmatprep.subr.mxu0 %v2735_v10 }
 0x21a   :  { %2335 = vmatpush3.msra.mxu0 %v2735_v10 }
 0x21b   :  { %2336 = vmatprep.subr.mxu0 %v2739_v11 }
 0x21c   :  { %2337 = vmatpush3.msra.mxu0 %v2739_v11 }
 0x21d   :  { %2338 = vmatprep.subr.mxu0 %v2743_v12 }
 0x21e   :  { %v2713_v52 = vpop.f32.mrf.mxu1  ;;  %2339 = vmatpush3.msra.mxu0 %v2743_v12 }
 0x21f   :  { %2354 = vmatprep.subr.mxu0 %v2568_v17 }
 0x220   :  { %v2715_v53 = vpop.f32.mrf.mxu1 }
 0x226   :  { %v2284_v55 = vpop.f32.mrf.mxu1 }
 0x227   :  { %v2720_v56 = vadd.f32 %v2284_v55, %v2717_v54 }
 0x228   :  { %v444_v57 = vpop.f32.mrf.mxu1 }
 0x229   :  { %v2723_v58 = vadd.f32 %v2717_v54, %v444_v57 }
 0x22e   :  { %v2748_v13 = vpop.f32.mrf.mxu1 }
 0x230   :  { %v2750_v14 = vpop.f32.mrf.mxu1 }
 0x232   :  { %v2752_v15 = vpop.f32.mrf.mxu1 }
 0x234   :  { %v2754_v19 = vpop.f32.mrf.mxu1 }
 0x2d7   :  { %v720_v2 = vpop.f32.mrf.mxu0 }
 0x2d8   :  { %v721_v3 = vadd.f32 %v2101_v1, %v720_v2 }
 0x2d9   :  { %v2323_v6 = vpop.f32.mrf.mxu0 }
 0x2da   :  { %2324 = vmatprep.subr.msk.mxu1 %vm737_vm4, %v721_v3 }
 0x2db   :  { %2325 = vmatpush3.msk.msra.mxu1 %vm737_vm4, %v721_v3 }
 0x2dc   :  { %2327 = vmatmul.mubr.msk.f32.vlgmr.msra.gmra.mxu1 %vm724_vm3, %v59_v7  ;;  %2346 = vmatprep.subr.msk.mxu1 %vm965_vm5, %v2768_v33 }
 0x2dd   :  { %2329 = vmatprep.mubr.msk.f32.mxu1 %vm724_vm3, %v60_v8  ;;  %2347 = vmatpush3.msk.msra.mxu1 %vm965_vm5, %v2768_v33  ;;  %v64_v8 = vld [vmem:[#allocation5 + $0x68] sm:$0x3] }
 0x2de   :  { %2365 = vmatprep.subr.mxu1 %v2568_v17 }
 0x2e0   :  { %2330 = vmatmul.mubr.msk.f32.gmra.mxu1 %vm724_vm3, %v61_v9 }
 0x39c   :  { %v2328_v21 = vpop.f32.mrf.mxu1 }
 0x39d   :  { %v827_v26 = vmul.f32 %v2328_v21, %v537_v23 }
 0x39e   :  { %v807_v24 = vpop.f32.mrf.mxu1 }
 0x39f   :  { %v826_v25 = vmul.f32 %v807_v24, %v532_v22  ;;  %v632_v22 = vadd.f32 %v2752_v15, %v2717_v54  ;;  %v627_v24 = vadd.f32 %v2717_v54, %v2754_v19 }
 0x3a0   :  { %v2331_v27 = vpop.f32.mrf.mxu1 }
 0x3a1   :  { %2340 = vmatprep.mubr.msk.f32.mxu0 %vm89_vm0, %v826_v25  ;;  %v829_v32 = vmul.f32 %v2331_v27, %v547_v29  ;;  %v622_v27 = vadd.f32 %v2748_v13, %v2717_v54  ;;  %v62_v13 = vld [vmem:[#allocation5 + $0x58] sm:$0xff] }
 0x3a2   :  { %v817_v30 = vpop.f32.mrf.mxu1  ;;  %2341 = vmatmul.mubr.msk.f32.vlgmr.msra.gmra.mxu0 %vm89_vm0, %v827_v26 }
 0x3a3   :  { %v828_v31 = vmul.f32 %v817_v30, %v542_v28  ;;  %v617_v30 = vadd.f32 %v2717_v54, %v2750_v14 }
 0x3a5   :  { %2343 = vmatprep.mubr.msk.f32.mxu0 %vm89_vm0, %v828_v31 }
 0x3a6   :  { %2344 = vmatmul.mubr.msk.f32.gmra.mxu0 %vm89_vm0, %v829_v32 }
 0x3a7   :  { %2362 = vmatprep.mubr.msk.f32.mxu0 %vm2569_vm1, %v2568_v17 }
 0x462   :  { %v2342_v34 = vpop.f32.mrf.mxu0 }
 0x463   :  { %v929_v39 = vsel %vm927_vm6, %v2342_v34, -inf }
 0x464   :  { %v908_v35 = vpop.f32.mrf.mxu0 }
 0x465   :  { %v928_v37 = vsel %vm927_vm6, %v908_v35, -inf }
 0x466   :  { %v2345_v36 = vpop.f32.mrf.mxu0  ;;  %v932_v42 = vmax.f32 %v928_v37, %v929_v39 }
 0x467   :  { %v931_v40 = vsel %vm927_vm6, %v2345_v36, -inf }
 0x468   :  { %v918_v38 = vpop.f32.mrf.mxu0 }
 0x469   :  { %v930_v41 = vsel %vm927_vm6, %v918_v38, -inf }
 0x46a   :  { %v933_v43 = vmax.f32 %v930_v41, %v931_v40 }
 0x46c   :  { %v934_v44 = vmax.f32 %v932_v42, %v933_v43 }
 0x46e   :  { %v935_v45 = vrot.slane %v934_v44, 4 }
 0x470   :  { %v936_v46 = vmax.f32 %v934_v44, %v935_v45 }
 0x472   :  { %v937_v47 = vrot.slane %v936_v46, 2 }
 0x474   :  { %v938_v49 = vmax.f32 %v936_v46, %v937_v47 }
 0x476   :  { %v939_v50 = vrot.slane %v938_v49, 1 }
 0x478   :  { %v940_v51 = vmax.f32 %v938_v49, %v939_v50 }
 0x47a   :  { %v941_v55 = vsub.f32 %v908_v35, %v940_v51  ;;  %v942_v57 = vsub.f32 %v2342_v34, %v940_v51  ;;  %v943_v59 = vsub.f32 %v918_v38, %v940_v51  ;;  %v944_v61 = vsub.f32 %v2345_v36, %v940_v51  ;;  %v63_v36 = vld [vmem:[#allocation5 + $0x60] sm:$0xff] }
 0x47c   :  { %v945_v62 = vmul.f32 1.442695, %v941_v55  ;;  %v947_v63 = vmul.f32 1.442695, %v942_v57  ;;  %v949_v0 = vmul.f32 1.442695, %v943_v59 }
 0x47d   :  { %v951_v1 = vmul.f32 1.442695, %v944_v61  ;;  %v65_v61 = vld [vmem:[#allocation5 + $0x6a] sm:$0x3] }
 0x47e   :  { %2476 = vpow2.f32 %v945_v62 }
 0x47f   :  { %2478 = vpow2.f32 %v947_v63 }
 0x480   :  { %2480 = vpow2.f32 %v949_v0 }
 0x481   :  { %2482 = vpow2.f32 %v951_v1 }
 0x48b   :  { %v2477_v2 = vpop.eup %2476 }
 0x48c   :  { %v2479_v3 = vpop.eup %2478  ;;  %2348 = vmatprep.mubr.msk.f32.mxu1 %vm927_vm6, %v2477_v2 }
 0x48d   :  { %v2481_v6 = vpop.eup %2480  ;;  %2349 = vmatmul.mubr.msk.f32.vlgmr.msra.gmra.mxu1 %vm927_vm6, %v2479_v3 }
 0x48e   :  { %v2483_v7 = vpop.eup %2482  ;;  %2351 = vmatprep.mubr.msk.f32.mxu1 %vm927_vm6, %v2481_v6 }
 0x48f   :  { %2366 = vmatpush3.msra.mxu1 %v2483_v7 }
 0x490   :  { %2367 = vmatprep.subr.mxu1 %v2568_v17 }
 0x491   :  { %2368 = vmatpush3.msra.mxu1 %v2481_v6 }
 0x492   :  { %2369 = vmatprep.subr.mxu1 %v2568_v17  ;;  %2352 = vmatmul.mubr.msk.f32.gmra.mxu1 %vm927_vm6, %v2483_v7 }
 0x493   :  { %2370 = vmatpush3.msra.mxu1 %v2479_v3  ;;  %2373 = vmatprep.mubr.msk.f32.mxu1 %vm2569_vm1, %v2568_v17 }
 0x494   :  { %2371 = vmatprep.subr.mxu1 %v2568_v17 }
 0x495   :  { %2372 = vmatpush3.msra.mxu1 %v2477_v2 }
 0x496   :  { %2374 = vmatmul.mubr.msk.f32.vlgmr.msra.gmra.mxu1 %vm89_vm0, %v64_v8 }
 0x497   :  { %2383 = vmatprep.mubr.msk.f32.mxu1 %vm724_vm3, %v62_v13  ;;  %v81_v13 = vld [vmem:[#allocation2 + $0x50] sm:$0xff] }
 0x54d   :  { %v2350_v9 = vpop.f32.mrf.mxu1 }
 0x54e   :  { %v1055_v31 = vmul.f32 %v2350_v9, %v622_v27  ;;  %v2133_v9 = vld [vmem:[#allocation5 + $0x7] ss:$0 sm:$0xff] }
 0x54f   :  { %v1035_v21 = vpop.f32.mrf.mxu1 }
 0x550   :  { %v1054_v19 = vmul.f32 %v1035_v21, %v617_v30 }
 0x552   :  { %v2353_v23 = vpop.f32.mrf.mxu1 }
 0x553   :  { %v1057_v25 = vmul.f32 %v2353_v23, %v632_v22 }
 0x554   :  { %v1045_v26 = vpop.f32.mrf.mxu1 }
 0x555   :  { %v1056_v28 = vmul.f32 %v1045_v26, %v627_v24  ;;  %2355 = vmatpush3.msra.mxu0 %v1057_v25 }
 0x556   :  { %2356 = vmatprep.subr.mxu0 %v2568_v17  ;;  %v1197_v29 = vpop.f32.mrf.mxu1 }
 0x557   :  { %2484 = vrcp.f32 %v1197_v29  ;;  %2357 = vmatpush3.msra.mxu0 %v1056_v28 }
 0x558   :  { %2358 = vmatprep.subr.mxu0 %v2568_v17  ;;  %v2375_v15 = vpop.f32.mrf.mxu1 }
 0x559   :  { %2359 = vmatpush3.msra.mxu0 %v1055_v31  ;;  %v74_v31 = vld [vmem:[#allocation2 + $0x38] sm:$0xff]  ;;  %v73_v15 = vld [vmem:[#allocation2 + $0x30] sm:$0xff] }
 0x55a   :  { %2360 = vmatprep.subr.mxu0 %v2568_v17 }
 0x55b   :  { %2361 = vmatpush3.msra.mxu0 %v1054_v19  ;;  %v72_v19 = vld [vmem:[#allocation2 + $0x28] sm:$0xff] }
 0x55c   :  { %2363 = vmatmul.mubr.msk.f32.vlgmr.msra.gmra.mxu0 %vm89_vm0, %v64_v8  ;;  %2376 = vmatprep.subr.mxu0 %v2568_v17 }
 0x55d   :  { %2377 = vmatpush3.msk.msra.mxu0 %vm965_vm5, %v2768_v33  ;;  %2378 = vmatprep.mubr.msk.f32.mxu0 %vm2569_vm1, %v2568_v17 }
 0x55e   :  { %2386 = vmatprep.subr.mxu0 %v2726_v60 }
 0x564   :  { %v2485_v54 = vpop.eup %2484 }
 0x565   :  { %2379 = vmatmul.mubr.msk.f32.vlgmr.msra.gmra.mxu0 %vm927_vm6, %v2485_v54  ;;  %v82_v54 = vld [vmem:[#allocation2 + $0x58] sm:$0xff] }
 0x566   :  { %2387 = vmatpush3.msra.mxu0 %v2726_v60 }
 0x567   :  { %2388 = vmatprep.subr.mxu0 %v2735_v10 }
 0x568   :  { %2389 = vmatpush3.msra.mxu0 %v2735_v10 }
 0x569   :  { %2390 = vmatprep.subr.mxu0 %v2739_v11 }
 0x56a   :  { %2391 = vmatpush3.msra.mxu0 %v2739_v11  ;;  %v350_v11 = vadd.f32 %v2756_v20, %v2715_v53 }
 0x56b   :  { %2392 = vmatprep.subr.mxu0 %v2743_v12 }
 0x56c   :  { %2393 = vmatpush3.msra.mxu0 %v2743_v12  ;;  %v355_v12 = vadd.f32 %v2713_v52, %v2756_v20 }
 0x56d   :  { %2409 = vmatprep.subr.mxu0 %v2568_v17 }
 0x61c   :  { %v1127_v14 = vpop.f32.mrf.mxu0 }
 0x61e   :  { %v2364_v32 = vpop.f32.mrf.mxu0 }
 0x61f   :  { %v79_v32 = vld [vmem:[#allocation2 + $0x40] sm:$0xff] }
 0x625   :  { %v1271_v60 = vpop.f32.mrf.mxu0 }
 0x626   :  { %v1275_v34 = vmul.f32 %v1271_v60, %v1127_v14  ;;  %v80_v14 = vld [vmem:[#allocation2 + $0x48] sm:$0xff] }
 0x627   :  { %v2380_v35 = vpop.f32.mrf.mxu0 }
 0x628   :  { %2381 = vmatprep.subr.msk.mxu1 %vm737_vm4, %v1275_v34 }
 0x629   :  { %2382 = vmatpush3.msk.msra.mxu1 %vm737_vm4, %v1275_v34 }
 0x62a   :  { %2384 = vmatmul.mubr.msk.f32.vlgmr.msra.gmra.mxu1 %vm724_vm3, %v63_v36  ;;  %2397 = vmatprep.subr.msk.mxu1 %vm965_vm5, %v2768_v33 }
 0x62b   :  { %2398 = vmatpush3.msk.msra.mxu1 %vm965_vm5, %v2768_v33 }
 0x62c   :  { %2402 = vmatprep.subr.mxu1 %v2568_v17 }
 0x6ea   :  { %v2385_v10 = vpop.f32.mrf.mxu1 }
 0x6eb   :  { %v1361_v39 = vmul.f32 %v2385_v10, %v355_v12  ;;  %v2135_v10 = vld [vmem:[#allocation5 + $0x2] ss:$0 sm:$0xff]  ;;  %v2136_v12 = vld [vmem:[#allocation5 + $0x3] ss:$0 sm:$0xff] }
 0x6ec   :  { %v1351_v37 = vpop.f32.mrf.mxu1 }
 0x6ed   :  { %v1360_v38 = vmul.f32 %v1351_v37, %v350_v11 }
 0x6ef   :  { %2394 = vmatprep.mubr.msk.f32.mxu0 %vm89_vm0, %v1360_v38 }
 0x6f0   :  { %2395 = vmatmul.mubr.msk.f32.vlgmr.msra.gmra.mxu0 %vm89_vm0, %v1361_v39 }
 0x6f1   :  { %2413 = vmatprep.mubr.msk.f32.mxu0 %vm2569_vm1, %v2568_v17 }
 0x7b0   :  { %v2396_v40 = vpop.f32.mrf.mxu0 }
 0x7b1   :  { %v1444_v42 = vsel %vm927_vm6, %v2396_v40, -inf }
 0x7b2   :  { %v1434_v41 = vpop.f32.mrf.mxu0 }
 0x7b3   :  { %v1443_v43 = vsel %vm927_vm6, %v1434_v41, -inf }
 0x7b4   :  { %v1445_v53 = vmax.f32 %v1443_v43, %v1444_v42 }
 0x7b6   :  { %v1446_v44 = vrot.slane %v1445_v53, 4 }
 0x7b8   :  { %v1447_v45 = vmax.f32 %v1445_v53, %v1446_v44 }
 0x7ba   :  { %v1448_v52 = vrot.slane %v1447_v45, 2 }
 0x7bc   :  { %v1449_v20 = vmax.f32 %v1447_v45, %v1448_v52  ;;  %v2137_v52 = vld [vmem:[#allocation5 + $0x8] ss:$0 sm:$0xff] }
 0x7be   :  { %v1450_v46 = vrot.slane %v1449_v20, 1 }
 0x7c0   :  { %v1451_v47 = vmax.f32 %v1449_v20, %v1450_v46 }
 0x7c2   :  { %v1452_v49 = vsub.f32 %v1434_v41, %v1451_v47  ;;  %v1453_v50 = vsub.f32 %v2396_v40, %v1451_v47 }
 0x7c4   :  { %v1454_v51 = vmul.f32 1.442695, %v1452_v49  ;;  %v1456_v55 = vmul.f32 1.442695, %v1453_v50 }
 0x7c6   :  { %2486 = vpow2.f32 %v1454_v51 }
 0x7c7   :  { %2488 = vpow2.f32 %v1456_v55 }
 0x7d3   :  { %v2487_v57 = vpop.eup %2486 }
 0x7d4   :  { %v2489_v59 = vpop.eup %2488  ;;  %2399 = vmatprep.mubr.msk.f32.mxu1 %vm927_vm6, %v2487_v57 }
 0x7d5   :  { %2410 = vmatpush3.msra.mxu0 %v2489_v59  ;;  %2400 = vmatmul.mubr.msk.f32.vlgmr.msra.gmra.mxu1 %vm927_vm6, %v2489_v59  ;;  %v2139_v59 = vld [vmem:[#allocation5 + $0x9] ss:$0 sm:$0xff] }
 0x7d6   :  { %2411 = vmatprep.subr.mxu0 %v2568_v17  ;;  %2406 = vmatprep.mubr.msk.f32.mxu1 %vm2569_vm1, %v2568_v17 }
 0x7d7   :  { %2412 = vmatpush3.msra.mxu0 %v2487_v57 }
 0x7d8   :  { %2414 = vmatmul.mubr.msk.f32.vlgmr.msra.gmra.mxu0 %vm129_vm2, %v65_v61  ;;  %2421 = vmatprep.subr.mxu0 %v2568_v17 }
 0x7d9   :  { %2429 = vmatprep.mubr.msk.f32.mxu0 %vm2569_vm1, %v2568_v17  ;;  %2422 = vmatpush3.msra.mxu0 %v1770_v4 }
 0x7da   :  { %2423 = vmatprep.subr.mxu0 %v2568_v17 }
 0x7db   :  { %2424 = vmatpush3.msra.mxu0 %v1768_v16 }
 0x7dc   :  { %2425 = vmatprep.subr.mxu0 %v2568_v17 }
 0x7dd   :  { %2426 = vmatpush3.msra.mxu0 %v1766_v18 }
 0x7de   :  { %2427 = vmatprep.subr.mxu0 %v2568_v17 }
 0x895   :  { %v2401_v62 = vpop.f32.mrf.mxu1 }
 0x896   :  { %v1540_v63 = vmul.f32 %v2401_v62, %v2720_v56  ;;  %v1764_v56 = vpop.permute.xlu1 %1763 }
 0x897   :  { %v1530_v0 = vpop.f32.mrf.mxu1  ;;  %2428 = vmatpush3.msra.mxu0 %v1764_v56 }
 0x898   :  { %v1539_v1 = vmul.f32 %v1530_v0, %v2723_v58  ;;  %v1680_v2 = vpop.f32.mrf.mxu0  ;;  %2403 = vmatpush3.msra.mxu1 %v1540_v63  ;;  %2443 = vmatprep.subr.mxu0 %v2568_v17 }
 0x899   :  { %2490 = vrcp.f32 %v1680_v2  ;;  %2404 = vmatprep.subr.mxu1 %v2568_v17 }
 0x89a   :  { %2405 = vmatpush3.msra.mxu1 %v1539_v1  ;;  %v2415_v3 = vpop.f32.mrf.mxu0 }
 0x89b   :  { %2407 = vmatmul.mubr.msk.f32.vlgmr.msra.gmra.mxu1 %vm129_vm2, %v65_v61  ;;  %2416 = vmatprep.subr.mxu1 %v2568_v17 }
 0x89c   :  { %2417 = vmatpush3.msk.msra.mxu1 %vm965_vm5, %v2768_v33  ;;  %2418 = vmatprep.mubr.msk.f32.mxu1 %vm2569_vm1, %v2568_v17 }
 0x89d   :  { %2432 = vmatprep.subr.mxu1 %v2568_v17 }
 0x8a6   :  { %v2491_v5 = vpop.eup %2490 }
 0x8a7   :  { %2419 = vmatmul.mubr.msk.f32.vlgmr.msra.gmra.mxu1 %vm927_vm6, %v2491_v5 }
 0x8a8   :  { %2440 = vmatprep.mubr.msk.f32.mxu1 %vm2569_vm1, %v2568_v17  ;;  %2433 = vmatpush3.msra.mxu1 %v74_v31 }
 0x8a9   :  { %2434 = vmatprep.subr.mxu1 %v2568_v17 }
 0x8aa   :  { %2435 = vmatpush3.msra.mxu1 %v73_v15 }
 0x8ab   :  { %2436 = vmatprep.subr.mxu1 %v2568_v17 }
 0x8ac   :  { %2437 = vmatpush3.msra.mxu1 %v72_v19 }
 0x8ad   :  { %2438 = vmatprep.subr.mxu1 %v2568_v17 }
 0x95b   :  { %v1610_v58 = vpop.f32.mrf.mxu1 }
 0x95d   :  { %v2408_v33 = vpop.f32.mrf.mxu1 }
 0x967   :  { %v1754_v6 = vpop.f32.mrf.mxu1 }
 0x968   :  { %v1758_v7 = vmul.f32 %v1754_v6, %v1610_v58 }
 0x969   :  { %v2420_v8 = vpop.f32.mrf.mxu1 }
 0x96a   :  { %2430 = vmatmul.mubr.msk.f32.vlgmr.msra.gmra.mxu0 %vm89_vm0, %v1758_v7 }
 0x96b   :  { %2459 = vmatprep.mubr.msk.f32.mxu0 %vm2569_vm1, %v2568_v17 }
 0xa2a   :  { %v1844_v21 = vpop.f32.mrf.mxu0 }
 0xa2b   :  { %v1845_v22 = vadd.f32 %v2133_v9, %v1844_v21 }
 0xa2c   :  { %v2431_v23 = vpop.f32.mrf.mxu0 }
 0xa2d   :  { %v2869_v24 = vadd.f32 %v1845_v22, %v2710_v48  ;;  %v71_v48 = vld [vmem:[#allocation2 + $0x20] sm:$0xff] }
 0xa2e   :  { %2439 = vmatpush3.msra.mxu1 %v71_v48 }
 0xa2f   :  { %v1850_v25 = vsel %vm1849_vm7, %v2869_v24, 0.0 }
 0xa30   :  { %1851 = vadd.xlane.f32.xlu0 %v1850_v25 }
 0xa46   :  { %1981 = vrot.lane.b32.xlu0 %v82_v54, %s2566_s2 }
 0xa4a   :  { %1977 = vrot.lane.b32.xlu0 %v80_v14, %s2566_s2 }
 0xa4e   :  { %1973 = vrot.lane.b32.xlu0 %v74_v31, %s2566_s2 }
 0xa52   :  { %1969 = vrot.lane.b32.xlu0 %v72_v19, %s2566_s2 }
 0xab9   :  { %v1852_v26 = vpop.xlane.xlu0 %1851 }
 0xaba   :  { %v1853_v27 = vmul.f32 0.03125, %v1852_v26 }
 0xabc   :  { %v1854_v28 = vsub.f32 %v2869_v24, %v1853_v27 }
 0xabd   :  { %v1982_v39 = vpop.permute.xlu0 %1981 }
 0xabe   :  { %v1855_v29 = vmul.f32 %v1854_v28, %v1854_v28  ;;  %2444 = vmatpush3.msra.mxu0 %v1982_v39 }
 0xabf   :  { %2445 = vmatprep.subr.mxu0 %v2568_v17 }
 0xac0   :  { %v1856_v30 = vsel %vm1849_vm7, %v1855_v29, 0.0 }
 0xac1   :  { %1857 = vadd.xlane.f32.xlu1 %v1856_v30  ;;  %v1978_v41 = vpop.permute.xlu0 %1977 }
 0xac5   :  { %v1974_v43 = vpop.permute.xlu0 %1973 }
 0xac9   :  { %v1970_v44 = vpop.permute.xlu0 %1969 }
 0xad2   :  { %1979 = vrot.lane.b32.xlu1 %v81_v13, %s2566_s2 }
 0xad6   :  { %1975 = vrot.lane.b32.xlu1 %v79_v32, %s2566_s2 }
 0xada   :  { %1971 = vrot.lane.b32.xlu1 %v73_v15, %s2566_s2 }
 0xade   :  { %1967 = vrot.lane.b32.xlu1 %v71_v48, %s2566_s2 }
 0xb4a   :  { %v1858_v60 = vpop.xlane.xlu1 %1857 }
 0xb4b   :  { %v1859_v34 = vmul.f32 0.03125, %v1858_v60 }
 0xb4d   :  { %v1860_v35 = vadd.f32 1e-06, %v1859_v34 }
 0xb4e   :  { %v1980_v40 = vpop.permute.xlu1 %1979 }
 0xb4f   :  { %2492 = vrsqrt.f32 %v1860_v35  ;;  %2446 = vmatpush3.msra.mxu0 %v1980_v40 }
 0xb50   :  { %2447 = vmatprep.subr.mxu0 %v2568_v17 }
 0xb51   :  { %2448 = vmatpush3.msra.mxu0 %v1978_v41 }
 0xb52   :  { %v1976_v42 = vpop.permute.xlu1 %1975  ;;  %2449 = vmatprep.subr.mxu0 %v2568_v17 }
 0xb53   :  { %2450 = vmatpush3.msra.mxu0 %v1976_v42 }
 0xb54   :  { %2451 = vmatprep.subr.mxu0 %v2568_v17 }
 0xb55   :  { %2452 = vmatpush3.msra.mxu0 %v1974_v43 }
 0xb56   :  { %v1972_v53 = vpop.permute.xlu1 %1971  ;;  %2453 = vmatprep.subr.mxu0 %v2568_v17 }
 0xb57   :  { %2454 = vmatpush3.msra.mxu0 %v1972_v53 }
 0xb58   :  { %2455 = vmatprep.subr.mxu0 %v2568_v17 }
 0xb59   :  { %2456 = vmatpush3.msra.mxu0 %v1970_v44 }
 0xb5a   :  { %v1968_v45 = vpop.permute.xlu1 %1967  ;;  %2457 = vmatprep.subr.mxu0 %v2568_v17 }
 0xb5b   :  { %2458 = vmatpush3.msra.mxu0 %v1968_v45 }
 0xb5c   :  { %v2493_v36 = vpop.eup %2492 }
 0xb5d   :  { %v1862_v11 = vmul.f32 %v2493_v36, %v1854_v28 }
 0xb5f   :  { %v1867_v37 = vmul.f32 %v2135_v10, %v1862_v11 }
 0xb61   :  { %v1872_v38 = vadd.f32 %v2136_v12, %v1867_v37 }
 0xb63   :  { %2441 = vmatmul.mubr.msk.f32.vlgmr.msra.gmra.mxu1 %vm89_vm0, %v1872_v38 }
 0xc23   :  { %v1946_v20 = vpop.f32.mrf.mxu1 }
 0xc24   :  { %v1947_v46 = vadd.f32 %v2137_v52, %v1946_v20 }
 0xc25   :  { %v2442_v47 = vpop.f32.mrf.mxu1 }
 0xc26   :  { %v1951_v49 = vmul.f32 0.70710677, %v1947_v46  ;;  %v1950_v51 = vmul.f32 0.5, %v1947_v46 }
 0xc28   :  { %2494 = verf.f32 %v1951_v49 }
 0xc35   :  { %v2495_v50 = vpop.eup %2494 }
 0xc36   :  { %v1953_v55 = vadd.f32 1.0, %v2495_v50 }
 0xc38   :  { %v1954_v57 = vmul.f32 %v1953_v55, %v1950_v51 }
 0xc3a   :  { %2460 = vmatmul.mubr.msk.f32.vlgmr.msra.gmra.mxu0 %vm1991_vm8, %v1954_v57 }
 0xcfa   :  { %v2061_v61 = vpop.f32.mrf.mxu0 }
 0xcfb   :  { %v2062_v62 = vadd.f32 %v2139_v59, %v2061_v61 }
 0xcfc   :  { %v2461_v63 = vpop.f32.mrf.mxu0 }
 0xcfd   :  { %v2065_v17 = vadd.f32 %v2062_v62, %v2869_v24 }
 0xcff   :  { %2066 = vst.msk [vmem:[#allocation7] sm:$0x3] %vm1849_vm7, %v2065_v17 }
 0xd00   :  { %2547 = shalt.err (!%p2544_p0)
}
 0xd01   :  { %2076 = dma.vmem_to_hbm [thread:$0]  %s2074_s10, 32, %s2902_s3, [#allocation4]  }
 0xd02   :  { %2560 = dma.done.wait [#allocation4], 32  }
 0xd03   :  { %2561 = vsyncadd [#allocation4], 4294967264 }
 0xd04   :  { %2080 = vsyncpa [#allocation3], 1 }
 0xd05   :  { %2081 = vsyncpa [#allocation6], 1 }
 0xd06   :  { %2082 = vsyncpa [#allocation4], 1 }

</bundles_post_ra>
